<compile_context>
chip_gen: v7x
topology: tpu7x:2x2x1
jax: 0.10.0
libtpu: 0.0.40
codegen_flags: <defaults>
</compile_context>

<pallas_src>
import jax
import jax.numpy as jnp
from jax.experimental import pallas as pl
from jax.experimental.pallas import tpu as pltpu

_LANE = 128
_MAX_TILE_ROWS = 8192          # fast path: 8192 x 128 f32 = 4 MiB per block
_MAX_TILE_D = 2048             # general path: D chunk (multiple of 128)
_X_BLOCK_BYTES = 2 * 1024 * 1024   # general path: ~2 MiB x-block budget


def _round_up(n, m):
    return ((n + m - 1) // m) * m


def _sublane_multiple(dtype):
    # Minimum second-to-last block dim for this dtype: f32->8, bf16->16, i8->32.
    itemsize = jnp.dtype(dtype).itemsize
    return max(8, 32 // max(itemsize, 1))


# ---------------------------------------------------------------------------
# Fast path: input_dim == 1  ->  y = x * w + b   (pure VPU, lane-dense slab)
# ---------------------------------------------------------------------------
def _scale_shift_kernel(w_ref, b_ref, x_ref, o_ref):
    # w_ref, b_ref: (1,) f32 in SMEM; x_ref/o_ref: (tile_rows, 128) VMEM tiles.
    w = w_ref[0]
    b = b_ref[0]
    x = x_ref[...].astype(jnp.float32)   # f32 compute (required on v5e for bf16)
    o_ref[...] = (x * w + b).astype(o_ref.dtype)


def _scale_shift_forward(x, weight, bias):
    """x: (B, 1) -> (B, 1), as an elementwise FMA on a (rows, 128) slab."""
    B = x.shape[0]
    dtype = x.dtype
    sub = _sublane_multiple(dtype)

    flat = x.reshape(-1)                      # (B,) -- contiguous reshape, free
    n = flat.shape[0]
    rows = pl.cdiv(n, _LANE)
    padded = rows * _LANE
    if padded != n:
        # <= 127 elements of pad; only copy in the wrapper when B % 128 != 0.
        flat = jnp.pad(flat, (0, padded - n))
    slab = flat.reshape(rows, _LANE)

    # Big blocks (amortize per-step overhead) but >= 2 blocks when possible so
    # the "parallel" axis spans both TensorCores on v7x.  Ragged last block is
    # masked by Pallas on writeback.
    tile_rows = min(rows, _MAX_TILE_ROWS,
                    max(sub, _round_up(pl.cdiv(rows, 2), sub)))
    grid = (pl.cdiv(rows, tile_rows),)

    out = pl.pallas_call(
        _scale_shift_kernel,
        out_shape=jax.ShapeDtypeStruct((rows, _LANE), dtype),
        grid=grid,
        in_specs=[
            pl.BlockSpec(memory_space=pltpu.MemorySpace.SMEM),    # weight scalar
            pl.BlockSpec(memory_space=pltpu.MemorySpace.SMEM),    # bias scalar
            pl.BlockSpec((tile_rows, _LANE), lambda i: (i, 0)),   # x slab tile
        ],
        out_specs=pl.BlockSpec((tile_rows, _LANE), lambda i: (i, 0)),
        compiler_params=pltpu.CompilerParams(
            dimension_semantics=("parallel",)),
    )(
        weight.reshape(-1).astype(jnp.float32),
        bias.reshape(-1).astype(jnp.float32),
        slab,
    )
    return out.reshape(-1)[:n].reshape(B, 1)


# ---------------------------------------------------------------------------
# General path: input_dim > 1, out_features == 1
#   y[i] = sum_d x[i, d] * w[0, d] + b
#   Grid = (B blocks "parallel", D blocks "arbitrary"); f32 accumulator scratch.
# ---------------------------------------------------------------------------
def _make_rowdot_kernel(D, tile_d, need_mask):
    def kernel(b_ref, w_ref, x_ref, o_ref, acc_ref):
        k = pl.program_id(1)

        @pl.when(k == 0)
        def _():
            acc_ref[...] = jnp.zeros_like(acc_ref)

        x = x_ref[...].astype(jnp.float32)       # (tile_b, tile_d)
        w = w_ref[...].astype(jnp.float32)       # (1, tile_d)
        prod = x * w
        if need_mask:
            # Mask the ragged D tail (garbage lanes of the partial last block).
            col = k * tile_d + jax.lax.broadcasted_iota(jnp.int32, prod.shape, 1)
            prod = jnp.where(col < D, prod, 0.0)
        acc_ref[...] += jnp.sum(prod, axis=-1, keepdims=True)

        @pl.when(k == pl.num_programs(1) - 1)
        def _():
            o_ref[...] = (acc_ref[...] + b_ref[0]).astype(o_ref.dtype)

    return kernel


def _general_forward(x, weight, bias):
    B, D = x.shape
    dtype = x.dtype
    sub = _sublane_multiple(dtype)
    itemsize = jnp.dtype(dtype).itemsize

    # D blocking: full D if it fits a lane block budget, else 2048-wide chunks.
    tile_d = D if D <= _MAX_TILE_D else _MAX_TILE_D
    nk = pl.cdiv(D, tile_d)
    need_mask = (D % tile_d) != 0

    # B blocking: keep x blocks ~<= 2 MiB (VMEM budget on v7x) and try to give
    # the "parallel" B axis >= 2 blocks for v7x's two TensorCores.
    budget_rows = max(sub, (_X_BLOCK_BYTES // (tile_d * itemsize)) // sub * sub)
    two_way = max(sub, _round_up(pl.cdiv(B, 2), sub))
    tile_b = min(budget_rows, two_way)
    if tile_b >= B:
        tile_b = B           # single full block (block dim == array dim is legal)
    nb = pl.cdiv(B, tile_b)

    kernel = _make_rowdot_kernel(D, tile_d, need_mask)

    out = pl.pallas_call(
        kernel,
        out_shape=jax.ShapeDtypeStruct((B, 1), dtype),
        grid=(nb, nk),
        in_specs=[
            pl.BlockSpec(memory_space=pltpu.MemorySpace.SMEM),      # bias scalar
            pl.BlockSpec((1, tile_d), lambda i, k: (0, k)),         # weight chunk
            pl.BlockSpec((tile_b, tile_d), lambda i, k: (i, k)),    # x tile
        ],
        out_specs=pl.BlockSpec((tile_b, 1), lambda i, k: (i, 0)),
        scratch_shapes=[pltpu.VMEM((tile_b, 1), jnp.float32)],
        compiler_params=pltpu.CompilerParams(
            dimension_semantics=("parallel", "arbitrary")),
    )(bias.reshape(-1).astype(jnp.float32), weight, x)
    return out


# ---------------------------------------------------------------------------
# Public forward:  y = x @ W^T + b   (same semantics as nn.Linear(input_dim, 1))
# ---------------------------------------------------------------------------
def linear_forward(x, weight, bias, *, min_pallas_elems=1 << 16):
    """x: (B, D), weight: (1, D), bias: (1,) -> (B, 1)."""
    B, D = x.shape
    if B * D < min_pallas_elems:
        # Small-problem bypass: launch + wrapper overhead dwarfs the FMA; let
        # XLA fuse it into neighbouring ops.
        y = x.astype(jnp.float32) @ weight.astype(jnp.float32).T \
            + bias.astype(jnp.float32)
        return y.astype(x.dtype)
    if D == 1:
        return _scale_shift_forward(x, weight, bias)
    return _general_forward(x, weight, bias)


def init_params(key, input_dim=1):
    # PyTorch nn.Linear default init: U(-1/sqrt(fan_in), 1/sqrt(fan_in))
    kw, kb = jax.random.split(key)
    bound = 1.0 / jnp.sqrt(jnp.asarray(input_dim, jnp.float32))
    weight = jax.random.uniform(kw, (1, input_dim), jnp.float32, -bound, bound)
    bias = jax.random.uniform(kb, (1,), jnp.float32, -bound, bound)
    return weight, bias


if __name__ == "__main__":
    key = jax.random.PRNGKey(0)
    ks = jax.random.split(key, 8)

    # 1) Module default: input_dim=1, tiny batch -> small-batch JAX bypass.
    B0, D0 = 8, 1
    x0 = jax.random.normal(ks[0], (B0, D0), dtype=jnp.float32)
    w0, b0 = init_params(ks[1], input_dim=D0)
    y0 = jax.block_until_ready(linear_forward(x0, w0, b0))
    y0_ref = x0 @ w0.T + b0
    assert y0.shape == (B0, 1)
    assert jnp.allclose(y0, y0_ref, atol=1e-5, rtol=1e-5)

    # 2) Fast-path Pallas kernel (D == 1), ragged batch exercising partial
    #    row blocks and the <=127-element slab pad.
    B1 = 4100
    x1 = jax.random.normal(ks[2], (B1, 1), dtype=jnp.float32)
    w1, b1 = init_params(ks[3], input_dim=1)
    y1 = jax.block_until_ready(linear_forward(x1, w1, b1, min_pallas_elems=0))
    y1_ref = x1 @ w1.T + b1
    assert y1.shape == (B1, 1)
    assert jnp.allclose(y1, y1_ref, atol=1e-5, rtol=1e-5)

    # 3) General Pallas path (D > 1) with D-blocking, ragged B and D tails.
    B2, D2 = 300, 3000
    x2 = jax.random.normal(ks[4], (B2, D2), dtype=jnp.float32)
    w2, b2 = init_params(ks[5], input_dim=D2)
    y2 = jax.block_until_ready(linear_forward(x2, w2, b2, min_pallas_elems=0))
    y2_ref = jnp.dot(x2, w2.T, precision=jax.lax.Precision.HIGHEST) + b2
    assert y2.shape == (B2, 1)
    assert jnp.allclose(y2, y2_ref, atol=1e-4, rtol=1e-4)

    # 4) General path with bf16 activations (checks dtype-aware sublane tiling).
    B3, D3 = 64, 200
    x3 = jax.random.normal(ks[6], (B3, D3), dtype=jnp.float32).astype(jnp.bfloat16)
    w3, b3 = init_params(ks[7], input_dim=D3)
    y3 = jax.block_until_ready(linear_forward(x3, w3, b3, min_pallas_elems=0))
    y3_ref = (jnp.dot(x3.astype(jnp.float32), w3.T,
                      precision=jax.lax.Precision.HIGHEST) + b3)
    assert y3.shape == (B3, 1)
    assert jnp.allclose(y3.astype(jnp.float32), y3_ref, atol=2e-2, rtol=2e-2)

    print("KERNEL_OK")
</pallas_src>

<mosaic_0001>
module attributes {stable_mosaic.version = 11 : i64} {
  func.func @_scale_shift_kernel(%arg0: i32, %arg1: memref<1xf32, #tpu.memory_space<smem>>, %arg2: memref<1xf32, #tpu.memory_space<smem>>, %arg3: memref<24x128xf32, #tpu.memory_space<vmem>>, %arg4: memref<24x128xf32, #tpu.memory_space<vmem>>) attributes {dimension_semantics = [#tpu.dimension_semantics<parallel>], iteration_bounds = array<i64: 2>, scalar_prefetch = 0 : i64, scratch_operands = 0 : i64, tpu.core_type = #tpu.core_type<tc>, window_params = [{transform_indices = @transform_0, window_bounds = array<i64: 1>}, {transform_indices = @transform_1, window_bounds = array<i64: 1>}, {transform_indices = @transform_2, window_bounds = array<i64: 24, 128>}, {transform_indices = @transform_3, window_bounds = array<i64: 24, 128>}]} {
    %c0 = arith.constant 0 : index
    %0 = memref.load %arg1[%c0] : memref<1xf32, #tpu.memory_space<smem>>
    %c0_0 = arith.constant 0 : index
    %1 = memref.load %arg2[%c0_0] : memref<1xf32, #tpu.memory_space<smem>>
    %c0_1 = arith.constant 0 : index
    %c0_2 = arith.constant 0 : index
    %2 = vector.load %arg3[%c0_1, %c0_2] : memref<24x128xf32, #tpu.memory_space<vmem>>, vector<24x128xf32>
    %3 = vector.broadcast %0 : f32 to vector<24x128xf32>
    %4 = arith.mulf %2, %3 : vector<24x128xf32>
    %5 = vector.broadcast %1 : f32 to vector<24x128xf32>
    %6 = arith.addf %4, %5 : vector<24x128xf32>
    %c0_3 = arith.constant 0 : index
    %c0_4 = arith.constant 0 : index
    %7 = vector.load %arg4[%c0_3, %c0_4] : memref<24x128xf32, #tpu.memory_space<vmem>>, vector<24x128xf32>
    tpu.vector_store %arg4[%c0_3, %c0_4], %6 {strides = array<i32>} : memref<24x128xf32, #tpu.memory_space<vmem>>, vector<24x128xf32>,
    return
  }
  func.func @transform_0(%arg0: i32) -> i32 {
    %c0_i32 = arith.constant 0 : i32
    %c0_i32_0 = arith.constant 0 : i32
    return %c0_i32 : i32
  }
  func.func @transform_1(%arg0: i32) -> i32 {
    %c0_i32 = arith.constant 0 : i32
    %c0_i32_0 = arith.constant 0 : i32
    return %c0_i32 : i32
  }
  func.func @transform_2(%arg0: i32) -> (i32, i32) {
    %c0_i32 = arith.constant 0 : i32
    %c0_i32_0 = arith.constant 0 : i32
    return %arg0, %c0_i32 : i32, i32
  }
  func.func @transform_3(%arg0: i32) -> (i32, i32) {
    %c0_i32 = arith.constant 0 : i32
    %c0_i32_0 = arith.constant 0 : i32
    return %arg0, %c0_i32 : i32, i32
  }
}

</mosaic_0001>

<bundles_post_ra>
// kernel: tpu_custom_call.1
= control target key start
LH: loop header
LB: loop body
LE: loop exit
PB: predicated region body
PF: predicated region fallthrough
CT: control target
= control target key end

     0   :  { %s677_s0 = inlined_call_operand.<no memory space> [shape: f32[1], index: 0, kind: input, shape index: {}]   ;;  %s678_s1 = inlined_call_operand.<no memory space> [shape: f32[1], index: 1, kind: input, shape index: {}]   ;;  %s679_s2 = inlined_call_operand.hbm [shape: f32[33,128], index: 2, kind: input, shape index: {}]   ;;  %s680_s3 = inlined_call_operand.hbm [shape: f32[33,128], index: 3, kind: output, shape index: {}]  }
   0x1   :  { %8 = sst [smem:[#allocation2]] %s677_s0 }
   0x2   :  { %9 = sst [smem:[#allocation3]] %s678_s1 }
   0x3   :  { %10 = vsyncpa [#allocation5], 0 }
   0x4   :  { %12 = vsyncpa [#allocation5 + $0x1], 0 }
   0x5   :  { %13 = vsyncpa [#allocation6], 0 }
   0x6   :  { %15 = vsyncpa [#allocation6 + $0x1], 0  ;;  %s507_s16 = smov 0   ;;  %s509_s17 = smov 0  }
   0x7   :  { %s511_s18 = smov 0   ;;  %s513_s19 = smov 0  }
   0x8 LB: > { %s528_s0 = sadd.s32 4294967295, %s473_s19   ;;  %s316_s1 = sadd.s32 4294967294, %s473_s19   ;;  %s473_s19 = sphi %s513_s19, %s690_s19   ;;  %s469_s18 = sphi %s511_s18, %s689_s18   ;;  %s465_s17 = sphi %s509_s17, %s688_s17   ;;  %s461_s16 = sphi %s507_s16, %s687_s16  }
   0x9   : > { %s532_s20 = sadd.s32 1, %s473_s19   ;;  %s70_s21 = sadd.s32 1, %s469_s18 }
   0xa   : > { %s67_s22 = ssub.s32 %s473_s19, %s532_s20  ;;  %p77_p0 = scmp.ne.s32.totalorder %s469_s18, %s465_s17 }
   0xb   : > { %p68_p1 = scmp.eq.s32.totalorder %s67_s22, 0  ;;  %p78_p2 = scmp.eq.s32.totalorder %s473_s19, 0 }
   0xc   : > { %p83_p3 = scmp.ne.s32.totalorder %s465_s17, %s461_s16  ;;  %p84_p4 = scmp.eq.s32.totalorder %s528_s0, 0 }
   0xd   : > { %s544_s23 = scalar_select %p68_p1, %s469_s18, %s70_s21  }
   0xe   : > { %p79_p5 = por %p78_p2, %p77_p0  ;;  %p546_p6 = por %p84_p4, %p83_p3 }
   0xf   : > { %p107_p7 = scmp.eq.s32.totalorder %s528_s0, 1  ;;  %p113_p8 = scmp.eq.s32.totalorder %s316_s1, 1 }
  0x10   : > { %p681_p11 = scmp.ge.s32.totalorder %s473_s19, 2 }
  0x11   : > { %p551_p9 = por %p107_p7, %p77_p0  ;;  %p555_p10 = por %p113_p8, %p83_p3 }
  0x12   : > { %135 = sbr.rel (%p681_p11) target bundleno = 60 (0x3c), region = 24 }
  0x13   : > { %s684_s26 = scalar_select %p555_p10, 1, 0 }
  0x19   : > { %138 = sbr.rel (!%p79_p5) target bundleno = 60 (0x3c), region = 28  ;;  %s139_s27 = sand.u32 (%p79_p5), 1, %s469_s18  }
  0x1a   : > { %s144_s28 = smul.u32 (%p79_p5), 3, %s473_s19  ;;  %s567_s6 = scalar_lea.sflag (%p79_p5), [#allocation5], %s139_s27 }
  0x1b   : > { %s334_s29 = smul.u32 (%p79_p5), 24, %s139_s27 }
  0x1c   : > { %s145_s30 = ssub.s32 (%p79_p5), 5, %s144_s28 }
  0x1d   : > { %p146_p12 = scmp.lt.s32.totalorder (%p79_p5), %s145_s30, 3  ;;  %s143_s7 = scalar_lea.vmem (%p79_p5), [#allocation4], %s334_s29 }
  0x20   : > { %s692_s30 = smov (!%p146_p12, %s145_s30), 3 }
  0x21   : > { %s564_s4 = sshll.u32 %s692_s30, 7 }
  0x22   : > { %s150_s5 = ssub.s32 384, %s564_s4 }
  0x23   : > { %151 = vsyncadd %s567_s6, %s150_s5  ;;  %p320_p13 = scmp.ne.s32.totalorder %s564_s4, 0  ;;  %s332_s8 = smul.u32 384, %s473_s19 }
  0x24   : > { %s156_s9 = sshll.u32 %s143_s7, 4  ;;  %s383_s1 = scalar_lea.hbm %s679_s2, 640  ;;  %s577_s9 = int_to_ptr.vmem [resolvable:$true] %s156_s9 }
  0x25   : > { %s575_s12 = scalar_lea.hbm %s679_s2, %s332_s8 }
  0x26   : > { %s379_s13 = scalar_lea.hbm %s575_s12, %s564_s4  ;;  %p384_p3 = scmp.lt.u32.totalorder %s575_s12, %s679_s2 }
  0x27   : > { %p380_p0 = scmp.ne.s32.totalorder %s575_s12, %s379_s13  ;;  %p385_p4 = scmp.lt.u32.totalorder %s383_s1, %s379_s13 }
  0x28   : > { %p387_p7 = scmp.lt.u32.totalorder %s379_s13, %s575_s12 }
  0x29   : > { %p381_p1 = pnand %p380_p0, %p320_p13  ;;  %p386_p5 = por %p385_p4, %p384_p3 }
  0x2b   : > { %p382_p2 = pneg %p381_p1  ;;  %p388_p8 = por %p387_p7, %p386_p5 }
  0x2d   : > { %p389_p12 = pnand %p388_p8, %p382_p2 }
  0x2f   : > { %392 = shalt.err (!%p389_p12)
}
  0x30   : > { %s393_s27 = scalar_lea.vmem %s577_s9, %s564_s4  ;;  %s475_s28 = smov [#allocation4]  }
  0x31   : > { %p394_p0 = scmp.ne.s32.totalorder %s577_s9, %s393_s27  ;;  %s397_s29 = sshll.u32 %s475_s28, 4  ;;  %s398_s29 = int_to_ptr.vmem [resolvable:$false] %s397_s29 }
  0x32   : > { %s399_s30 = scalar_lea.vmem %s398_s29, 768  ;;  %p400_p10 = scmp.lt.s32.totalorder %s577_s9, %s398_s29 }
  0x33   : > { %p395_p1 = pnand %p394_p0, %p320_p13  ;;  %p401_p3 = scmp.lt.s32.totalorder %s399_s30, %s393_s27 }
  0x35   : > { %p396_p11 = pneg %p395_p1  ;;  %p402_p4 = por %p401_p3, %p400_p10 }
  0x37   : > { %p403_p5 = pnand %p402_p4, %p396_p11 }
  0x39   : > { %406 = shalt.err (!%p403_p5)
}
  0x3a   : > { %s476_s5 = smov 128   ;;  %s477_s7 = smov 8  }
  0x3b   : > { %162 = dma.hbm_to_vmem [thread:$0]  (%p320_p13), %s575_s12, %s564_s4, %s577_s9, %s567_s6, %s476_s5, %s476_s5, %s477_s7  }
  0x3c PF: > { %p324_p2 = scmp.ge.s32.totalorder %s473_s19, 1  ;;  %p164_p7 = scmp.lt.s32.totalorder %s473_s19, 3 }
  0x3e   : > { %p165_p8 = pnand %p324_p2, %p164_p7 }
  0x3f   : > { %s607_s8 = sand.u32 (!%p165_p8), 1, %s465_s17  }
  0x40   : > { %168 = sbr.rel (%p165_p8) target bundleno = 113 (0x71), region = 32  ;;  %s171_s11 = scalar_lea.sflag (!%p165_p8), [#allocation5], %s607_s8 }
  0x41   : > { %s335_s10 = smul.u32 (!%p165_p8), 24, %s607_s8 }
  0x43   : > { %s174_s13 = scalar_lea.vmem (!%p165_p8), [#allocation4], %s335_s10 }
  0x47   : > { %452 = dma.done.wait (%p546_p6), %s171_s11, 384  }
  0x48   : > { %454 = vsyncadd (%p546_p6), %s171_s11, 4294966912  ;;  %s207_s4 = sld [smem:[#allocation2]]  ;;  %v209_v0 = vld [vmem:[%s174_s13] sm:$0xff]  ;;  %v210_v3 = vld [vmem:[%s174_s13 + $0x8] sm:$0xff]  ;;  %s196_s9 = scalar_lea.vmem [#allocation7], %s335_s10 }
  0x49   : > { %s208_s6 = sld [smem:[#allocation3]]  ;;  %v211_v6 = vld [vmem:[%s174_s13 + $0x10] sm:$0xff]  ;;  %s224_s24 = scalar_lea.sflag [#allocation6], %s607_s8 }
  0x4a   : > { %s231_s12 = smul.u32 (%p551_p9), 3, %s528_s0 }
  0x4c   : > { %s232_s14 = ssub.s32 (%p551_p9), 5, %s231_s12 }
  0x4d   : > { %p233_p6 = scmp.lt.s32.totalorder (%p551_p9), %s232_s14, 3 }
  0x4e   : > { %v212_v1 = vstv %s207_s4  ;;  %230 = sbr.rel (!%p551_p9) target bundleno = 113 (0x71), region = 40 }
  0x4f   : > { %v216_v2 = vstv %s208_s6  ;;  %v213_v4 = vmul.f32 %v212_v1, %v209_v0  ;;  %v214_v5 = vmul.f32 %v212_v1, %v210_v3  ;;  %v215_v7 = vmul.f32 %v212_v1, %v211_v6 }
  0x51   : > { %v217_v8 = vadd.f32 %v216_v2, %v213_v4  ;;  %v218_v9 = vadd.f32 %v216_v2, %v214_v5  ;;  %v219_v10 = vadd.f32 %v216_v2, %v215_v7 }
  0x53   : > { %220 = vst [vmem:[%s196_s9] sm:$0xff] %v217_v8  ;;  %221 = vst [vmem:[%s196_s9 + $0x8] sm:$0xff] %v218_v9 }
  0x54   : > { %222 = vst [vmem:[%s196_s9 + $0x10] sm:$0xff] %v219_v10 }
  0x55   : > { %s694_s14 = smov (!%p233_p6, %s232_s14), 3 }
  0x56   : > { %s619_s15 = sshll.u32 %s694_s14, 7 }
  0x57   : > { %s237_s1 = ssub.s32 384, %s619_s15 }
  0x58   : > { %238 = vsyncadd %s224_s24, %s237_s1  ;;  %p326_p10 = scmp.ne.s32.totalorder %s619_s15, 0  ;;  %s333_s21 = smul.u32 384, %s528_s0 }
  0x59   : > { %s243_s25 = sshll.u32 %s196_s9, 4  ;;  %s478_s30 = smov [#allocation7]   ;;  %s631_s25 = int_to_ptr.vmem [resolvable:$true] %s243_s25 }
  0x5a   : > { %s629_s28 = scalar_lea.hbm %s680_s3, %s333_s21  ;;  %s407_s29 = scalar_lea.vmem %s631_s25, %s619_s15 }
  0x5b   : > { %p408_p9 = scmp.ne.s32.totalorder %s631_s25, %s407_s29  ;;  %s411_s5 = sshll.u32 %s478_s30, 4  ;;  %s412_s5 = int_to_ptr.vmem [resolvable:$false] %s411_s5 }
  0x5c   : > { %s413_s0 = scalar_lea.vmem %s412_s5, 768  ;;  %p414_p12 = scmp.lt.s32.totalorder %s631_s25, %s412_s5 }
  0x5d   : > { %p409_p11 = pnand %p408_p9, %p326_p10  ;;  %p415_p0 = scmp.lt.s32.totalorder %s413_s0, %s407_s29 }
  0x5f   : > { %p410_p13 = pneg %p409_p11  ;;  %p416_p1 = por %p415_p0, %p414_p12 }
  0x61   : > { %p417_p3 = pnand %p416_p1, %p410_p13 }
  0x63   : > { %420 = shalt.err (!%p417_p3)
}
  0x64   : > { %s421_s7 = scalar_lea.hbm %s629_s28, %s619_s15  ;;  %s425_s13 = scalar_lea.hbm %s680_s3, 640 }
  0x65   : > { %p422_p4 = scmp.ne.s32.totalorder %s629_s28, %s421_s7  ;;  %p426_p7 = scmp.lt.u32.totalorder %s629_s28, %s680_s3 }
  0x66   : > { %p427_p8 = scmp.lt.u32.totalorder %s425_s13, %s421_s7  ;;  %p429_p9 = scmp.lt.u32.totalorder %s421_s7, %s629_s28 }
  0x67   : > { %p423_p5 = pnand %p422_p4, %p326_p10 }
  0x68   : > { %p428_p6 = por %p427_p8, %p426_p7 }
  0x69   : > { %p424_p2 = pneg %p423_p5 }
  0x6a   : > { %p430_p11 = por %p429_p9, %p428_p6 }
  0x6c   : > { %p431_p13 = pnand %p430_p11, %p424_p2 }
  0x6e   : > { %434 = shalt.err (!%p431_p13)
}
  0x6f   : > { %s479_s9 = smov 128   ;;  %s480_s12 = smov 8  }
  0x70   : > { %249 = dma.vmem_to_hbm [thread:$0]  (%p326_p10), %s631_s25, %s619_s15, %s629_s28, %s224_s24, %s479_s9, %s479_s9, %s480_s12  }
  0x71 PF: > { %s258_s14 = sand.u32 1, %s461_s16   ;;  %p685_p12 = scmp.ne.s32.totalorder %s684_s26, 0 }
  0x72   : > { %p686_p0 = scmp.ge.s32.totalorder %s473_s19, 2  ;;  %s259_s1 = scalar_lea.sflag [#allocation6], %s258_s14 }
  0x74   : > { %p339_p1 = pnand %p686_p0, %p685_p12 }
  0x76   : > { %456 = dma.done.wait (!%p339_p1), %s259_s1, 384  }
  0x77   : > { %458 = vsyncadd (!%p339_p1), %s259_s1, 4294966912  ;;  %p18_p3 = scmp.ge.s32.totalorder %s532_s20, 4   ;;  %s687_s16 = smov %s465_s17 }
  0x78   : > { %s688_s17 = smov %s469_s18  ;;  %s689_s18 = smov %s544_s23 }
  0x79   : > { %s690_s19 = smov %s532_s20  ;;  %20 = sbr.rel (!%p18_p3) target bundleno = 8 (0x8), region = 77 }
  0x80   :  { %264 = vsyncpa [#allocation5], 1 }
  0x81   :  { %266 = vsyncpa [#allocation5 + $0x1], 1 }
  0x82   :  { %267 = vsyncpa [#allocation6], 1 }
  0x83   :  { %269 = vsyncpa [#allocation6 + $0x1], 1 }

</bundles_post_ra>
